<compile_context>
chip_gen: v5e
topology: v5e:2x2
jax: 0.10.0
libtpu: 0.0.40
codegen_flags: <defaults>
</compile_context>

<pallas_src>
import jax
import jax.numpy as jnp
from jax.experimental import pallas as pl
from jax.experimental.pallas import tpu as pltpu

EPS = 1e-5          # InstanceNorm2d default eps
NEG_SLOPE = 0.2     # LeakyReLU slope


def _enc_kernel(a_ref, w_ref, o_ref):
    # a_ref: (BT, 2, K4, S)   bf16 -- row-parity planes, col-taps pre-expanded,
    #                                  flat spatial S = (Ho+1)*Wo on the lane axis
    # w_ref: (4, C_out, K4)   bf16 -- one (C_out, 4*C_in) weight slab per kernel row
    # o_ref: (BT, C_out, HW)  f32  -- HW = Ho*Wo, row-major (reshapes straight to NCHW)
    bt = a_ref.shape[0]
    s = a_ref.shape[3]
    hw = o_ref.shape[2]
    wo = s - hw                       # S - Ho*Wo == Wo
    inv_hw = 1.0 / hw

    # Hoist the (small) weight loads out of the batch loop.
    w0 = w_ref[0]
    w1 = w_ref[1]
    w2 = w_ref[2]
    w3 = w_ref[3]

    def body(b, carry):
        a = a_ref[b]                                                     # (2, K4, S)
        # Conv: 4 kernel-row taps, each a (C_out, K4) @ (K4, HW) MXU dot on a
        # contiguous flat-HW window of the matching row-parity plane.
        conv = jnp.dot(w0, a[0, :, 0:hw], preferred_element_type=jnp.float32)
        conv = conv + jnp.dot(w1, a[1, :, 0:hw], preferred_element_type=jnp.float32)
        conv = conv + jnp.dot(w2, a[0, :, wo:wo + hw], preferred_element_type=jnp.float32)
        conv = conv + jnp.dot(w3, a[1, :, wo:wo + hw], preferred_element_type=jnp.float32)

        # InstanceNorm2d (affine=False, biased variance over spatial dims), f32 math.
        mean = jnp.sum(conv, axis=-1, keepdims=True) * inv_hw            # (C_out, 1)
        ex2 = jnp.sum(conv * conv, axis=-1, keepdims=True) * inv_hw      # (C_out, 1)
        var = jnp.maximum(ex2 - mean * mean, 0.0)
        y = (conv - mean) * jax.lax.rsqrt(var + EPS)

        # LeakyReLU(0.2)
        y = jnp.maximum(y, NEG_SLOPE * y)

        o_ref[b] = y.astype(o_ref.dtype)
        return carry

    jax.lax.fori_loop(0, bt, body, 0, unroll=True)


def _prep_input(x):
    """(N, C, H, W) f32 -> (N, 2, 4*C, (Ho+1)*Wo) bf16.

    A[n, pi, c*4 + j, r*Wo + m] = x_padded[n, c, 2*r + pi, 2*m + j]
    (pi = row parity, j = column tap).  Only the column taps are expanded (2x in
    elements, ~1x in bytes at bf16); the 4 row taps are fused in-kernel.
    """
    n, c, h, w = x.shape
    assert h % 2 == 0 and w % 2 == 0, "k4/s2/p1 conv expects even H, W"
    ho, wo = h // 2, w // 2
    r = ho + 1
    xp = jnp.pad(x, ((0, 0), (0, 0), (1, 1), (1, 1)))
    xr = xp.reshape(n, c, r, 2, w + 2)                   # rows -> (r, parity)
    cols = [xr[..., j:j + 2 * wo:2] for j in range(4)]   # each (n, c, r, 2, wo)
    a = jnp.stack(cols, axis=2)                          # (n, c, 4, r, 2, wo)
    a = jnp.transpose(a, (0, 4, 1, 2, 3, 5))             # (n, 2, c, 4, r, wo)
    a = a.reshape(n, 2, c * 4, r * wo)
    return a.astype(jnp.bfloat16), ho, wo


def _prep_weight(weight):
    """(C_out, C_in, 4, 4) f32 -> (4, C_out, 4*C_in) bf16 with K ordering (c, j)."""
    c_out, c_in, kh, kw = weight.shape
    w = jnp.transpose(weight, (2, 0, 1, 3)).reshape(kh, c_out, c_in * kw)
    return w.astype(jnp.bfloat16)


def _pick_batch_tile(n, per_img_bytes, w_bytes):
    budget = 16 << 20    # conservative block budget (fits v5e/v6e/v7x scoped VMEM)
    best = 1
    for d in range(1, n + 1):
        if n % d:
            continue
        if n >= 2 and n // d < 2:
            continue     # keep >= 2 grid steps so v7x's two TensorCores both get work
        if 2 * d * per_img_bytes + 2 * w_bytes <= budget:
            best = d
    return best


def enc_forward(x, weight):
    """x: (N, C_in, H, W) f32; weight: (C_out, C_in, 4, 4) f32.
    Returns (N, C_out, H//2, W//2) f32, matching the PyTorch module's forward."""
    n, c_in, h, w = x.shape
    c_out = weight.shape[0]
    a, ho, wo = _prep_input(x)                      # (N, 2, K4, S) bf16
    w_t = _prep_weight(weight)                      # (4, C_out, K4) bf16
    k4 = c_in * 4
    s = (ho + 1) * wo
    hw = ho * wo

    a_img = 2 * k4 * s * 2                          # bf16 input block bytes / image
    o_img = c_out * hw * 4                          # f32 output block bytes / image
    w_bytes = 4 * c_out * k4 * 2
    batch_tile = _pick_batch_tile(n, a_img + o_img, w_bytes)
    grid = (n // batch_tile,)

    # double-buffered in/out blocks + weights + in-kernel f32 temporaries + slack.
    needed = 2 * batch_tile * (a_img + o_img) + 2 * w_bytes + 4 * o_img + (4 << 20)
    vmem_limit = int(min(max(needed, 16 << 20), 40 << 20))

    cost = pl.CostEstimate(
        flops=2 * n * c_out * (c_in * 16) * hw + 6 * n * c_out * hw,
        transcendentals=n * c_out,
        bytes_accessed=a.size * 2 + w_t.size * 2 + n * c_out * hw * 4,
    )

    out = pl.pallas_call(
        _enc_kernel,
        out_shape=jax.ShapeDtypeStruct((n, c_out, hw), jnp.float32),
        grid=grid,
        in_specs=[
            pl.BlockSpec((batch_tile, 2, k4, s), lambda i: (i, 0, 0, 0)),
            pl.BlockSpec((4, c_out, k4), lambda i: (0, 0, 0)),
        ],
        out_specs=pl.BlockSpec((batch_tile, c_out, hw), lambda i: (i, 0, 0)),
        compiler_params=pltpu.CompilerParams(
            dimension_semantics=("parallel",),
            vmem_limit_bytes=vmem_limit,
        ),
        cost_estimate=cost,
    )(a, w_t)

    # (N, C_out, HW) -> (N, C_out, Ho, Wo): pure reshape, no transpose needed.
    return out.reshape(n, c_out, ho, wo)


if __name__ == "__main__":
    # Small shapes consistent with the module: Conv2d(in_size=4, out_size=8, 4, 2, 1)
    N, C_IN, H, W = 2, 4, 16, 16
    C_OUT = 8

    key = jax.random.PRNGKey(0)
    kx, kw = jax.random.split(key)
    x = jax.random.normal(kx, (N, C_IN, H, W), dtype=jnp.float32)
    fan_in = C_IN * 4 * 4
    weight = jax.random.normal(kw, (C_OUT, C_IN, 4, 4), dtype=jnp.float32) / jnp.sqrt(fan_in)

    y = enc_forward(x, weight)
    jax.block_until_ready(y)
    assert y.shape == (N, C_OUT, H // 2, W // 2)
    assert bool(jnp.isfinite(y).all())
    print("KERNEL_OK")
</pallas_src>

<mosaic_0001>
module attributes {stable_mosaic.version = 11 : i64} {
  func.func @_enc_kernel(%arg0: i32, %arg1: memref<1x2x16x72xbf16, #tpu.memory_space<vmem>>, %arg2: memref<4x8x16xbf16, #tpu.memory_space<vmem>>, %arg3: memref<1x8x64xf32, #tpu.memory_space<vmem>>) attributes {dimension_semantics = [#tpu.dimension_semantics<parallel>], iteration_bounds = array<i64: 2>, scalar_prefetch = 0 : i64, scratch_operands = 0 : i64, tpu.core_type = #tpu.core_type<tc>, window_params = [{transform_indices = @transform_0, window_bounds = array<i64: 1, 2, 16, 72>}, {pipeline_mode = #tpu.pipeline_mode<synchronous>, transform_indices = @transform_1, window_bounds = array<i64: 4, 8, 16>}, {transform_indices = @transform_2, window_bounds = array<i64: 1, 8, 64>}]} {
    %c0 = arith.constant 0 : index
    %c0_0 = arith.constant 0 : index
    %c0_1 = arith.constant 0 : index
    %0 = vector.load %arg2[%c0, %c0_0, %c0_1] : memref<4x8x16xbf16, #tpu.memory_space<vmem>>, vector<1x8x16xbf16>
    %1 = vector.shape_cast %0 : vector<1x8x16xbf16> to vector<8x16xbf16>
    %c1 = arith.constant 1 : index
    %c0_2 = arith.constant 0 : index
    %c0_3 = arith.constant 0 : index
    %2 = vector.load %arg2[%c1, %c0_2, %c0_3] : memref<4x8x16xbf16, #tpu.memory_space<vmem>>, vector<1x8x16xbf16>
    %3 = vector.shape_cast %2 : vector<1x8x16xbf16> to vector<8x16xbf16>
    %c2 = arith.constant 2 : index
    %c0_4 = arith.constant 0 : index
    %c0_5 = arith.constant 0 : index
    %4 = vector.load %arg2[%c2, %c0_4, %c0_5] : memref<4x8x16xbf16, #tpu.memory_space<vmem>>, vector<1x8x16xbf16>
    %5 = vector.shape_cast %4 : vector<1x8x16xbf16> to vector<8x16xbf16>
    %c3 = arith.constant 3 : index
    %c0_6 = arith.constant 0 : index
    %c0_7 = arith.constant 0 : index
    %6 = vector.load %arg2[%c3, %c0_6, %c0_7] : memref<4x8x16xbf16, #tpu.memory_space<vmem>>, vector<1x8x16xbf16>
    %7 = vector.shape_cast %6 : vector<1x8x16xbf16> to vector<8x16xbf16>
    %c0_i32 = arith.constant 0 : i32
    %8 = arith.index_cast %c0_i32 : i32 to index
    %c0_8 = arith.constant 0 : index
    %c0_9 = arith.constant 0 : index
    %c0_10 = arith.constant 0 : index
    %9 = vector.load %arg1[%8, %c0_8, %c0_9, %c0_10] : memref<1x2x16x72xbf16, #tpu.memory_space<vmem>>, vector<1x2x16x72xbf16>
    %10 = vector.shape_cast %9 : vector<1x2x16x72xbf16> to vector<2x16x72xbf16>
    %11 = vector.extract_strided_slice %10 {offsets = [0, 0, 0], sizes = [1, 16, 64], strides = [1, 1, 1]} : vector<2x16x72xbf16> to vector<1x16x64xbf16>
    %12 = vector.shape_cast %11 : vector<1x16x64xbf16> to vector<16x64xbf16>
    %cst = arith.constant dense<0.000000e+00> : vector<8x64xf32>
    %13 = tpu.matmul %1, %12, %cst {dimension_numbers = #tpu.dot_dimension_numbers<[1], [0], [0], [1], [0, 0, 1, 1], [], []>} : vector<8x16xbf16>, vector<16x64xbf16>, vector<8x64xf32> -> vector<8x64xf32>
    %14 = vector.extract_strided_slice %10 {offsets = [1, 0, 0], sizes = [1, 16, 64], strides = [1, 1, 1]} : vector<2x16x72xbf16> to vector<1x16x64xbf16>
    %15 = vector.shape_cast %14 : vector<1x16x64xbf16> to vector<16x64xbf16>
    %cst_11 = arith.constant dense<0.000000e+00> : vector<8x64xf32>
    %16 = tpu.matmul %3, %15, %cst_11 {dimension_numbers = #tpu.dot_dimension_numbers<[1], [0], [0], [1], [0, 0, 1, 1], [], []>} : vector<8x16xbf16>, vector<16x64xbf16>, vector<8x64xf32> -> vector<8x64xf32>
    %17 = arith.addf %13, %16 : vector<8x64xf32>
    %18 = vector.extract_strided_slice %10 {offsets = [0, 0, 8], sizes = [1, 16, 64], strides = [1, 1, 1]} : vector<2x16x72xbf16> to vector<1x16x64xbf16>
    %19 = vector.shape_cast %18 : vector<1x16x64xbf16> to vector<16x64xbf16>
    %cst_12 = arith.constant dense<0.000000e+00> : vector<8x64xf32>
    %20 = tpu.matmul %5, %19, %cst_12 {dimension_numbers = #tpu.dot_dimension_numbers<[1], [0], [0], [1], [0, 0, 1, 1], [], []>} : vector<8x16xbf16>, vector<16x64xbf16>, vector<8x64xf32> -> vector<8x64xf32>
    %21 = arith.addf %17, %20 : vector<8x64xf32>
    %22 = vector.extract_strided_slice %10 {offsets = [1, 0, 8], sizes = [1, 16, 64], strides = [1, 1, 1]} : vector<2x16x72xbf16> to vector<1x16x64xbf16>
    %23 = vector.shape_cast %22 : vector<1x16x64xbf16> to vector<16x64xbf16>
    %cst_13 = arith.constant dense<0.000000e+00> : vector<8x64xf32>
    %24 = tpu.matmul %7, %23, %cst_13 {dimension_numbers = #tpu.dot_dimension_numbers<[1], [0], [0], [1], [0, 0, 1, 1], [], []>} : vector<8x16xbf16>, vector<16x64xbf16>, vector<8x64xf32> -> vector<8x64xf32>
    %25 = arith.addf %21, %24 : vector<8x64xf32>
    %cst_14 = arith.constant dense<0.000000e+00> : vector<8xf32>
    %26 = vector.multi_reduction <add>, %25, %cst_14 [1] : vector<8x64xf32> to vector<8xf32>
    %27 = vector.shape_cast %26 : vector<8xf32> to vector<8x1xf32>
    %cst_15 = arith.constant 1.562500e-02 : f32
    %28 = vector.broadcast %cst_15 : f32 to vector<8x1xf32>
    %29 = arith.mulf %27, %28 : vector<8x1xf32>
    %30 = arith.mulf %25, %25 : vector<8x64xf32>
    %cst_16 = arith.constant dense<0.000000e+00> : vector<8xf32>
    %31 = vector.multi_reduction <add>, %30, %cst_16 [1] : vector<8x64xf32> to vector<8xf32>
    %32 = vector.shape_cast %31 : vector<8xf32> to vector<8x1xf32>
    %cst_17 = arith.constant 1.562500e-02 : f32
    %33 = vector.broadcast %cst_17 : f32 to vector<8x1xf32>
    %34 = arith.mulf %32, %33 : vector<8x1xf32>
    %35 = arith.mulf %29, %29 : vector<8x1xf32>
    %36 = arith.subf %34, %35 : vector<8x1xf32>
    %cst_18 = arith.constant 0.000000e+00 : f32
    %37 = vector.broadcast %cst_18 : f32 to vector<8x1xf32>
    %38 = arith.maximumf %36, %37 : vector<8x1xf32>
    %39 = vector.broadcast %29 : vector<8x1xf32> to vector<8x64xf32>
    %40 = arith.subf %25, %39 : vector<8x64xf32>
    %cst_19 = arith.constant 9.99999974E-6 : f32
    %41 = vector.broadcast %cst_19 : f32 to vector<8x1xf32>
    %42 = arith.addf %38, %41 : vector<8x1xf32>
    %43 = math.rsqrt %42 : vector<8x1xf32>
    %44 = vector.broadcast %43 : vector<8x1xf32> to vector<8x64xf32>
    %45 = arith.mulf %40, %44 : vector<8x64xf32>
    %cst_20 = arith.constant 2.000000e-01 : f32
    %46 = vector.broadcast %cst_20 : f32 to vector<8x64xf32>
    %47 = arith.mulf %46, %45 : vector<8x64xf32>
    %48 = arith.maximumf %45, %47 : vector<8x64xf32>
    %49 = arith.index_cast %c0_i32 : i32 to index
    %c0_21 = arith.constant 0 : index
    %c0_22 = arith.constant 0 : index
    %50 = vector.load %arg3[%49, %c0_21, %c0_22] : memref<1x8x64xf32, #tpu.memory_space<vmem>>, vector<1x8x64xf32>
    %51 = vector.shape_cast %50 : vector<1x8x64xf32> to vector<8x64xf32>
    %52 = vector.shape_cast %48 : vector<8x64xf32> to vector<1x8x64xf32>
    tpu.vector_store %arg3[%49, %c0_21, %c0_22], %52 {strides = array<i32>} : memref<1x8x64xf32, #tpu.memory_space<vmem>>, vector<1x8x64xf32>,
    %c1_i32 = arith.constant 1 : i32
    return
  }
  func.func @transform_0(%arg0: i32) -> (i32, i32, i32, i32) {
    %c0_i32 = arith.constant 0 : i32
    %c0_i32_0 = arith.constant 0 : i32
    %c0_i32_1 = arith.constant 0 : i32
    %c0_i32_2 = arith.constant 0 : i32
    return %arg0, %c0_i32, %c0_i32_0, %c0_i32_1 : i32, i32, i32, i32
  }
  func.func @transform_1(%arg0: i32) -> (i32, i32, i32) {
    %c0_i32 = arith.constant 0 : i32
    %c0_i32_0 = arith.constant 0 : i32
    %c0_i32_1 = arith.constant 0 : i32
    %c0_i32_2 = arith.constant 0 : i32
    return %c0_i32, %c0_i32_0, %c0_i32_1 : i32, i32, i32
  }
  func.func @transform_2(%arg0: i32) -> (i32, i32, i32) {
    %c0_i32 = arith.constant 0 : i32
    %c0_i32_0 = arith.constant 0 : i32
    %c0_i32_1 = arith.constant 0 : i32
    return %arg0, %c0_i32, %c0_i32_0 : i32, i32, i32
  }
}

</mosaic_0001>

<bundles_post_ra>
// kernel: tpu_custom_call.1
= control target key start
LH: loop header
LB: loop body
LE: loop exit
PB: predicated region body
PF: predicated region fallthrough
CT: control target
= control target key end

     0   :  { %7 = vsyncpa [#allocation3], 0  ;;  %s794_s0 = inlined_call_operand.hbm [shape: bf16[2,2,16,72], index: 0, kind: input, shape index: {}]   ;;  %s795_s1 = inlined_call_operand.hbm [shape: bf16[4,8,16], index: 1, kind: input, shape index: {}]   ;;  %s796_s2 = inlined_call_operand.hbm [shape: f32[2,8,64], index: 2, kind: output, shape index: {}]  }
   0x1   :  { %9 = vsyncpa [#allocation3 + $0x1], 0 }
   0x2   :  { %10 = vsyncpa [#allocation6], 0 }
   0x3   :  { %11 = vsyncpa [#allocation4], 0 }
   0x4   :  { %13 = vsyncpa [#allocation4 + $0x1], 0  ;;  %s646_s9 = smov 0   ;;  %s648_s10 = smov 0  }
   0x5   :  { %s650_s11 = smov 0   ;;  %s652_s12 = smov 0  }
   0x6 LB: > { %s667_s13 = sadd.s32 4294967295, %s625_s12   ;;  %s403_s14 = sadd.s32 4294967294, %s625_s12   ;;  %s625_s12 = sphi %s652_s12, %s806_s12   ;;  %s621_s11 = sphi %s650_s11, %s805_s11   ;;  %s617_s10 = sphi %s648_s10, %s804_s10   ;;  %s613_s9 = sphi %s646_s9, %s803_s9  }
   0x7   : > { %p39_p0 = scmp.ne.s32.totalorder %s617_s10, %s613_s9  ;;  %p40_p1 = scmp.eq.s32.totalorder %s667_s13, 0 }
   0x8   : > { %p84_p2 = scmp.eq.s32.totalorder %s667_s13, 1  ;;  %p90_p3 = scmp.eq.s32.totalorder %s403_s14, 1 }
   0x9   : > { %p676_p4 = por %p40_p1, %p39_p0  ;;  %p404_p5 = scmp.ge.s32.totalorder %s625_s12, 1 }
   0xa   : > { %p681_p6 = por %p90_p3, %p39_p0  ;;  %p97_p7 = scmp.lt.s32.totalorder %s625_s12, 3 }
   0xb   : > { %s108_s19 = sshll.u32 %s795_s1, 4  ;;  %s627_s21 = smov [#allocation5]   ;;  %s109_s19 = int_to_ptr.hbm [resolvable:$true] %s108_s19 }
   0xc   : > { %p689_p8 = pnand %p404_p5, %p97_p7  ;;  %s110_s22 = sshll.u32 %s627_s21, 4  ;;  %s111_s22 = int_to_ptr.vmem [resolvable:$true] %s110_s22 }
   0xd   : > { %s699_s23 = sadd.s32 1, %s625_s12   ;;  %s628_s24 = smov 64  }
   0xe   : > { %p441_p9 = pneg %p689_p8  ;;  %s629_s25 = smov 4  }
   0xf   : > { %s23_s26 = ssub.s32 %s625_s12, %s699_s23  ;;  %s26_s27 = sadd.s32 1, %s621_s11 }
  0x10   : > { %p442_p10 = pnand %p441_p9, %p40_p1  ;;  %p24_p12 = scmp.eq.s32.totalorder %s23_s26, 0 }
  0x11   : > { %p33_p13 = scmp.ne.s32.totalorder %s621_s11, %s617_s10  ;;  %p34_p0 = scmp.eq.s32.totalorder %s625_s12, 0 }
  0x12   : > { %444 = dma.hbm_to_vmem [thread:$0]  (!%p442_p10), %s109_s19, 256, %s111_s22, [#allocation6], %s628_s24, %s628_s24, %s629_s25  }
  0x13   : > { %s711_s28 = scalar_select %p24_p12, %s621_s11, %s26_s27  }
  0x14   : > { %p715_p3 = por %p84_p2, %p33_p13  ;;  %p454_p5 = scmp.lt.s32.totalorder %s625_s12, 2 }
  0x15   : > { %s124_s30 = sand.u32 1, %s621_s11   ;;  %s430_s3 = sshll.u32 %s625_s12, 4 }
  0x16   : > { %p35_p7 = por %p34_p0, %p33_p13  ;;  %s407_s4 = sshll.u32 %s124_s30, 4 }
  0x17   : > { %s133_s7 = scalar_lea.hbm %s794_s0, %s430_s3  ;;  %s128_s14 = scalar_lea.vmem [#allocation2], %s407_s4 }
  0x18   : > { %s134_s8 = sshll.u32 %s133_s7, 4  ;;  %s136_s17 = sshll.u32 %s128_s14, 4  ;;  %s135_s8 = int_to_ptr.hbm [resolvable:$true] %s134_s8  ;;  %s137_s17 = int_to_ptr.vmem [resolvable:$true] %s136_s17 }
  0x19   : > { %p725_p9 = pnand %p454_p5, %p35_p7  ;;  %s125_s19 = scalar_lea.sflag [#allocation3], %s124_s30 }
  0x1a   : > { %s525_s21 = sshra.s32 %s135_s8, 4  ;;  %s532_s3 = scalar_lea.hbm %s794_s0, 32  ;;  %s526_s21 = int_to_ptr.hbm [resolvable:$true] %s525_s21 }
  0x1b   : > { %s527_s22 = scalar_lea.hbm %s526_s21, 16  ;;  %p529_p10 = pneg %p725_p9 }
  0x1c   : > { %p528_p2 = scmp.ne.s32.totalorder %s526_s21, %s527_s22  ;;  %p533_p0 = scmp.lt.s32.totalorder %s526_s21, %s794_s0 }
  0x1d   : > { %p534_p5 = scmp.lt.s32.totalorder %s532_s3, %s527_s22 }
  0x1e   : > { %p530_p12 = pnand %p529_p10, %p528_p2 }
  0x1f   : > { %p535_p7 = por %p534_p5, %p533_p0 }
  0x20   : > { %p531_p13 = pneg %p530_p12 }
  0x22   : > { %p536_p11 = pnand %p535_p7, %p531_p13 }
  0x24   : > { %539 = shalt.err (!%p536_p11)
}
  0x25   : > { %448 = dma.hbm_to_vmem [thread:$0]  (!%p725_p9), %s135_s8, 256, %s137_s17, %s125_s19, %s628_s24, %s628_s24, %s629_s25  }
  0x26   : > { %148 = sbr.rel (%p689_p8) target bundleno = 467 (0x1d3), region = 28  ;;  %s745_s30 = sand.u32 (!%p689_p8), 1, %s617_s10  }
  0x27   : > { %s411_s6 = sshll.u32 (!%p689_p8), %s745_s30, 4  ;;  %s151_s7 = scalar_lea.sflag (!%p689_p8), [#allocation3], %s745_s30 }
  0x28   : > { %s154_s14 = scalar_lea.vmem (!%p689_p8), [#allocation2], %s411_s6 }
  0x2b   : > { %600 = dma.done.wait (%p676_p4), %s151_s7, 256  }
  0x2c   : > { %602 = vsyncadd (%p676_p4), %s151_s7, 4294967040 }
  0x2d   : > { %604 = dma.done.wait (%p40_p1), [#allocation6], 256  }
  0x2e   : > { %606 = vsyncadd (%p40_p1), [#allocation6], 4294967040  ;;  %v431_v0 = vld [vmem:[%s154_s14] sm:$0xff]  ;;  %v432_v1 = vld [vmem:[%s154_s14 + $0x8] sm:$0xff]  ;;  %s630_s20 = smov 120   ;;  %vm199_vm0 = vcmask 130048  }
  0x2f   : > { %238 = vrot.lane.b32.xlu0 %v431_v0, %s630_s20  ;;  %210 = vmatpush.bf16.msra.mxu0 %v432_v1  ;;  %v184_v2 = vld [vmem:[#allocation5 + $0x4] sm:$0xf]  ;;  %v182_v3 = vld [vmem:[#allocation5] sm:$0xf]  ;;  %v186_v5 = vld [vmem:[#allocation5 + $0x8] sm:$0xf] }
  0x30   : > { %232 = vmatpush.bf16.msra.mxu1 %v431_v0  ;;  %v188_v7 = vld [vmem:[#allocation5 + $0xc] sm:$0xf]  ;;  %vm278_vm1 = vcmask 523264   ;;  %s413_s15 = sshll.u32 %s745_s30, 3  ;;  %s427_s24 = sshll.u32 %s667_s13, 3 }
  0x31   : > { %s318_s17 = scalar_lea.hbm %s796_s2, %s427_s24  ;;  %s180_s18 = scalar_lea.vmem [#allocation7], %s413_s15 }
  0x32   : > { %418 = vmatmul.msk.bf16.vlgmr.msra.gmra.mxu0 %vm199_vm0, %v184_v2  ;;  %s320_s19 = sshll.u32 %s180_s18, 4  ;;  %s322_s21 = sshll.u32 %s318_s17, 4  ;;  %s321_s19 = int_to_ptr.vmem [resolvable:$true] %s320_s19  ;;  %s323_s21 = int_to_ptr.hbm [resolvable:$true] %s322_s21 }
  0x33   : > { %423 = vmatmul.msk.bf16.vlgmr.msra.gmra.mxu1 %vm199_vm0, %v182_v3  ;;  %s308_s13 = scalar_lea.sflag [#allocation4], %s745_s30  ;;  %s569_s22 = sshra.s32 %s323_s21, 4  ;;  %s570_s22 = int_to_ptr.hbm [resolvable:$true] %s569_s22 }
  0x34   : > { %s571_s26 = scalar_lea.hbm %s570_s22, 8  ;;  %s575_s4 = scalar_lea.hbm %s796_s2, 16 }
  0x35   : > { %p572_p1 = scmp.ne.s32.totalorder %s570_s22, %s571_s26  ;;  %p576_p11 = scmp.lt.s32.totalorder %s570_s22, %s796_s2 }
  0x36   : > { %p577_p9 = scmp.lt.s32.totalorder %s575_s4, %s571_s26 }
  0x37   : > { %258 = vrot.lane.b32.xlu0 %v432_v1, %s630_s20  ;;  %p573_p4 = pnand %p572_p1, %p715_p3 }
  0x38   : > { %p578_p2 = por %p577_p9, %p576_p11 }
  0x39   : > { %p574_p8 = pneg %p573_p4 }
  0x3b   : > { %p579_p10 = pnand %p578_p2, %p574_p8 }
  0xa1   : > { %v239_v4 = vpop.permute.xlu0 %238 }
  0xa2   : > { %251 = vmatpush.bf16.msra.mxu2 %v239_v4 }
  0xa5   : > { %424 = vmatmul.msk.bf16.vlgmr.msra.gmra.mxu2 %vm199_vm0, %v186_v5 }
  0xa9   : > { %v259_v6 = vpop.permute.xlu0 %258 }
  0xaa   : > { %271 = vmatpush.bf16.msra.mxu3 %v259_v6 }
  0xad   : > { %425 = vmatmul.msk.bf16.vlgmr.msra.gmra.mxu3 %vm199_vm0, %v188_v7 }
  0xaf   : > { %v212_v8 = vpop.f32.mrf.mxu0 }
  0xb0   : > { %v234_v9 = vpop.f32.mrf.mxu1 }
  0xb1   : > { %v235_v13 = vadd.f32 %v234_v9, %v212_v8 }
  0xb7   : > { %v214_v10 = vpop.f32.mrf.mxu0 }
  0xb8   : > { %v236_v11 = vpop.f32.mrf.mxu1 }
 0x128   : > { %v253_v12 = vpop.f32.mrf.mxu2 }
 0x129   : > { %v257_v14 = vadd.f32 %v253_v12, %v235_v13 }
 0x130   : > { %v255_v15 = vpop.f32.mrf.mxu2  ;;  %v273_v16 = vpop.f32.mrf.mxu3 }
 0x131   : > { %v277_v17 = vadd.f32 %v273_v16, %v257_v14 }
 0x133   : > { %v279_v18 = vsel %vm278_vm1, %v277_v17, 0.0  ;;  %v283_v19 = vmul.f32 %v277_v17, %v277_v17 }
 0x134   : > { %280 = vadd.xlane.f32.xlu1 %v279_v18 }
 0x135   : > { %v284_v21 = vsel %vm278_vm1, %v283_v19, 0.0 }
 0x138   : > { %v275_v20 = vpop.f32.mrf.mxu3 }
 0x13c   : > { %285 = vadd.xlane.f32.xlu1 %v284_v21 }
 0x1a7   : > { %v281_v22 = vpop.xlane.xlu1 %280 }
 0x1a8   : > { %v282_v23 = vmul.f32 0.015625, %v281_v22 }
 0x1aa   : > { %v288_v25 = vmul.f32 %v282_v23, %v282_v23  ;;  %v291_v36 = vsub.f32 %v277_v17, %v282_v23 }
 0x1af   : > { %v286_v24 = vpop.xlane.xlu1 %285 }
 0x1b0   : > { %v287_v26 = vmul.f32 0.015625, %v286_v24 }
 0x1b2   : > { %v289_v27 = vsub.f32 %v287_v26, %v288_v25 }
 0x1b4   : > { %v290_v28 = vmax.f32 %v289_v27, 0.0 }
 0x1b6   : > { %v292_v29 = vadd.f32 1e-05, %v290_v28 }
 0x1b8   : > { %493 = vrsqrt.f32 %v292_v29  ;;  %vm299_vm3 = vweird.f32 %v292_v29 }
 0x1be   : > { %v494_v30 = vpop.eup %493 }
 0x1bf   : > { %v294_v31 = vmul.f32 %v494_v30, %v292_v29  ;;  %vm300_vm2 = vweird.f32 %v494_v30 }
 0x1c0   : > { %vm301_vm4 = vmor %vm299_vm3, %vm300_vm2 }
 0x1c1   : > { %v295_v32 = vmul.f32 %v494_v30, %v294_v31 }
 0x1c3   : > { %v296_v33 = vmul.f32 0.5, %v295_v32 }
 0x1c5   : > { %v297_v34 = vsub.f32 1.5, %v296_v33 }
 0x1c7   : > { %v298_v35 = vmul.f32 %v494_v30, %v297_v34 }
 0x1c9   : > { %v302_v37 = vsel %vm301_vm4, %v494_v30, %v298_v35 }
 0x1ca   : > { %v303_v38 = vmul.f32 %v302_v37, %v291_v36 }
 0x1cc   : > { %v304_v39 = vmul.f32 0.2, %v303_v38 }
 0x1ce   : > { %v305_v40 = vmax.f32 %v303_v38, %v304_v39 }
 0x1d0   : > { %306 = vst.msk [vmem:[%s180_s18] sm:$0xff] %vm278_vm1, %v305_v40 }
 0x1d1   : > { %582 = shalt.err (!%p579_p10)
}
 0x1d2   : > { %439 = dma.vmem_to_hbm [thread:$0]  (%p715_p3), %s321_s19, 128, %s323_s21, %s308_s13  }
 0x1d3 PF: > { %s334_s30 = sand.u32 1, %s613_s9   ;;  %p802_p12 = scmp.ge.s32.totalorder %s625_s12, 2 }
 0x1d4   : > { %s335_s7 = scalar_lea.sflag [#allocation4], %s334_s30 }
 0x1d5   : > { %p450_p13 = pnand %p802_p12, %p681_p6 }
 0x1d7   : > { %p451_p0 = pneg %p450_p13 }
 0x1d9   : > { %608 = dma.done.wait (%p451_p0), %s335_s7, 128  }
 0x1da   : > { %610 = vsyncadd (%p451_p0), %s335_s7, 4294967168  ;;  %p16_p5 = scmp.ge.s32.totalorder %s699_s23, 4   ;;  %s803_s9 = smov %s617_s10 }
 0x1db   : > { %s804_s10 = smov %s621_s11  ;;  %s805_s11 = smov %s711_s28 }
 0x1dc   : > { %s806_s12 = smov %s699_s23  ;;  %18 = sbr.rel (!%p16_p5) target bundleno = 6 (0x6), region = 80 }
 0x1e1   :  { %341 = vsyncpa [#allocation3], 1 }
 0x1e2   :  { %343 = vsyncpa [#allocation3 + $0x1], 1 }
 0x1e3   :  { %344 = vsyncpa [#allocation6], 1 }
 0x1e4   :  { %345 = vsyncpa [#allocation4], 1 }
 0x1e5   :  { %347 = vsyncpa [#allocation4 + $0x1], 1 }

</bundles_post_ra>
